<compile_context>
chip_gen: v7x
topology: tpu7x:2x2x1
jax: 0.10.0
libtpu: 0.0.40
codegen_flags: <defaults>
</compile_context>

<pallas_src>
import functools

import jax
import jax.numpy as jnp
from jax.experimental import pallas as pl
from jax.experimental.pallas import tpu as pltpu


# Conservative scoped-VMEM budget: fits v5e's 16 MiB default and leaves
# headroom on v7x's 32 MiB scoped default (64 MiB physical).
_VMEM_BUDGET_BYTES = 12 * 1024 * 1024


def _round_up(x, m):
    return ((x + m - 1) // m) * m


def _choose_block_b(B, D, n_batched_arrays):
    """Pick the batch tile.

    Goals: (a) each grid step moves multi-MiB so the ~0.35 us per-step overhead
    is amortised, (b) the double-buffered working set stays inside every
    generation's scoped-VMEM default, (c) the grid has >= 2 steps whenever the
    batch permits so "parallel" can shard across v7x's two TensorCores,
    (d) ragged batches stay tiled (Pallas masks the partial last block).
    """
    bytes_per_row = 2 * n_batched_arrays * D * 4      # double-buffered f32 rows
    weight_bytes = 2 * 3 * D * D * 4                  # (3D, D) weight, 2 buffers
    avail = max(_VMEM_BUDGET_BYTES - weight_bytes, 2 * 1024 * 1024)
    bm = min(2048, max(avail // bytes_per_row, 8))
    bm = max((bm // 8) * 8, 8)                        # sublane-aligned tile
    if B >= 16:
        bm = min(bm, _round_up(pl.cdiv(B, 2), 8))     # guarantee >= 2 grid steps
    if bm >= B:
        bm = B                                        # tiny batch: one full block
    return int(bm)


def _pid_kernel(dt, cur_ref, tgt_ref, int_ref, last_ref, w_ref,
                corr_ref, new_int_ref, new_last_ref):
    """One batch tile of the fused PID step.

    W_all rows:  [0:D)   = (Kp + dt*Ki + Kd/dt).T   (error term)
                 [D:2D)  = Ki.T                     (integral-buffer term)
                 [2D:3D) = -(1/dt) * Kd.T           (last-error term)
    Buffers may be a single broadcast row (right after reset) or batched;
    broadcasting handles both.
    """
    d = cur_ref.shape[-1]
    error = tgt_ref[...] - cur_ref[...]                      # (bm, D)
    integral = int_ref[...]                                  # (1 or bm, D)
    last = last_ref[...]                                     # (1 or bm, D)

    corr = jnp.dot(error, w_ref[0:d, :], preferred_element_type=jnp.float32)
    corr = corr + jnp.dot(integral, w_ref[d:2 * d, :],
                          preferred_element_type=jnp.float32)
    corr = corr + jnp.dot(last, w_ref[2 * d:3 * d, :],
                          preferred_element_type=jnp.float32)

    corr_ref[...] = corr.astype(corr_ref.dtype)
    new_int_ref[...] = (integral + error * dt).astype(new_int_ref.dtype)   # torch buffer update
    new_last_ref[...] = error.astype(new_last_ref.dtype)                    # torch buffer update


def prepare_pid_weights(kp_weight, ki_weight, kd_weight, dt):
    """Fold Kp/Ki/Kd into one stacked (3D, D) RHS matrix.

    Call ONCE at model-load time (re-call only if dt or the weights change).
    torch Linear is y = x @ W.T, so:
        correction = error @ (Kp + dt*Ki + Kd/dt).T
                   + integral_buf @ Ki.T
                   + last_error  @ (-(1/dt) * Kd).T
    """
    dt = float(dt)
    inv_dt = 1.0 / dt
    w_err = (kp_weight + dt * ki_weight + inv_dt * kd_weight).T
    w_int = ki_weight.T
    w_last = (-inv_dt) * kd_weight.T
    return jnp.concatenate([w_err, w_int, w_last], axis=0).astype(jnp.float32)


def geometric_pid_forward(current, target, dt,
                          kp_weight=None, ki_weight=None, kd_weight=None,
                          integral_term=None, last_error_vector=None,
                          *, w_all=None, block_b=None, donate_state=True):
    """Pallas-backed GeometricPIDNet.forward, including the buffer updates the
    torch module performs in-place.

    Returns (correction (B,D), new_integral_term (B,D), new_last_error (B,D)).
    When the buffers are already batched (B, D) and donate_state=True they are
    donated to the corresponding outputs (do not reuse them afterwards).
    NOTE: for very small batches (a few rows) a plain XLA fusion may beat the
    kernel-launch latency; this wrapper always uses the kernel.
    """
    B, D = current.shape
    dt = float(dt)

    if w_all is None:  # fallback; ideally hoisted to model-load time
        w_all = prepare_pid_weights(kp_weight, ki_weight, kd_weight, dt)
    assert w_all.shape == (3 * D, D)

    # Buffers as 2-D rows: 1 row right after reset(), B rows afterwards.
    int_2d = integral_term.reshape(-1, D).astype(jnp.float32)
    last_2d = last_error_vector.reshape(-1, D).astype(jnp.float32)
    assert int_2d.shape[0] in (1, B), int_2d.shape
    assert last_2d.shape[0] in (1, B), last_2d.shape
    int_batched = int_2d.shape[0] != 1
    last_batched = last_2d.shape[0] != 1

    n_batched = 5 + int(int_batched) + int(last_batched)
    bm = block_b if block_b is not None else _choose_block_b(B, D, n_batched)
    grid = (pl.cdiv(B, bm),)          # ragged last block is masked by Pallas

    act_spec = pl.BlockSpec((bm, D), lambda i: (i, 0))

    def rows_spec(arr):
        if arr.shape[0] == 1:
            return pl.BlockSpec((1, D), lambda i: (0, 0))      # broadcast row
        return act_spec                                        # batched buffer

    w_spec = pl.BlockSpec((3 * D, D), lambda i: (0, 0))        # resident weight

    # Donate batched state buffers to their updated outputs (in-place step).
    aliases = {}
    if donate_state:
        if int_batched:
            aliases[2] = 1
        if last_batched:
            aliases[3] = 2

    flops = 2 * B * D * (3 * D) + 6 * B * D
    bytes_accessed = 4 * (2 * B * D                    # current, target
                          + int_2d.size + last_2d.size # state buffers
                          + 3 * D * D                  # stacked weight
                          + 3 * B * D)                 # three outputs

    return pl.pallas_call(
        functools.partial(_pid_kernel, dt),
        grid=grid,
        out_shape=(jax.ShapeDtypeStruct((B, D), jnp.float32),   # correction
                   jax.ShapeDtypeStruct((B, D), jnp.float32),   # new integral
                   jax.ShapeDtypeStruct((B, D), jnp.float32)),  # new last error
        in_specs=[act_spec, act_spec, rows_spec(int_2d), rows_spec(last_2d),
                  w_spec],
        out_specs=(act_spec, act_spec, act_spec),
        input_output_aliases=aliases,
        compiler_params=pltpu.CompilerParams(
            dimension_semantics=("parallel",)),
        cost_estimate=pl.CostEstimate(flops=flops, transcendentals=0,
                                      bytes_accessed=bytes_accessed),
    )(current.astype(jnp.float32), target.astype(jnp.float32),
      int_2d, last_2d, w_all)


def _reference_forward(current, target, dt, kp_w, ki_w, kd_w, integral, last_err):
    """Pure-JAX mirror of the torch module (also returns the buffer updates)."""
    integral = jnp.atleast_2d(integral)
    last_err = jnp.atleast_2d(last_err)
    error = target - current
    integral_new = integral + error * dt
    derivative = (error - last_err) / dt
    corr = error @ kp_w.T + integral_new @ ki_w.T + derivative @ kd_w.T
    return corr, integral_new, error


if __name__ == "__main__":
    # Small demo shapes; B chosen so the cdiv grid has 2 steps (v7x megacore
    # path) with a ragged last block, D lane-aligned for the MXU.
    B, D = 40, 128
    dt = 0.1

    key = jax.random.PRNGKey(0)
    ks = jax.random.split(key, 8)

    # nn.Linear(D, D, bias=False)-style deterministic synthetic weights.
    bound = 1.0 / float(D ** 0.5)
    kp_w = jax.random.uniform(ks[0], (D, D), jnp.float32, -bound, bound)
    ki_w = jax.random.uniform(ks[1], (D, D), jnp.float32, -bound, bound)
    kd_w = jax.random.uniform(ks[2], (D, D), jnp.float32, -bound, bound)

    # (D,) buffers (post-reset layout); small non-zero values so the broadcast
    # integral / last-error paths are actually exercised.
    integral_term = jax.random.normal(ks[3], (D,), jnp.float32) * 0.01
    last_error_vector = jax.random.normal(ks[4], (D,), jnp.float32) * 0.01

    current = jax.random.normal(ks[5], (B, D), jnp.float32)
    target = jax.random.normal(ks[6], (B, D), jnp.float32)

    # Hoisted weight prep (model-load time).
    w_all = prepare_pid_weights(kp_w, ki_w, kd_w, dt)

    # --- step 1: (D,) broadcast buffers --------------------------------------
    corr, new_int, new_last = geometric_pid_forward(
        current, target, dt, kp_w, ki_w, kd_w,
        integral_term, last_error_vector, w_all=w_all)
    jax.block_until_ready((corr, new_int, new_last))

    ref_corr, ref_int, ref_last = _reference_forward(
        current, target, dt, kp_w, ki_w, kd_w, integral_term, last_error_vector)

    assert corr.shape == (B, D) and corr.dtype == jnp.float32
    assert jnp.allclose(corr, ref_corr, atol=1e-3, rtol=1e-3), (
        f"step1 corr max abs err {jnp.max(jnp.abs(corr - ref_corr))}")
    assert jnp.allclose(new_int, ref_int, atol=1e-3, rtol=1e-3)
    assert jnp.allclose(new_last, ref_last, atol=1e-3, rtol=1e-3)

    # --- step 2: feed the (B, D) buffers back (donated / updated in place) ---
    current2 = jax.random.normal(ks[7], (B, D), jnp.float32)
    target2 = jax.random.normal(jax.random.fold_in(key, 99), (B, D), jnp.float32)

    corr2, new_int2, new_last2 = geometric_pid_forward(
        current2, target2, dt, kp_w, ki_w, kd_w, new_int, new_last, w_all=w_all)
    jax.block_until_ready((corr2, new_int2, new_last2))
    # NOTE: new_int / new_last were donated to the step-2 outputs above; do not
    # touch them after this point.

    ref_corr2, ref_int2, ref_last2 = _reference_forward(
        current2, target2, dt, kp_w, ki_w, kd_w, ref_int, ref_last)

    assert jnp.allclose(corr2, ref_corr2, atol=1e-3, rtol=1e-3), (
        f"step2 corr max abs err {jnp.max(jnp.abs(corr2 - ref_corr2))}")
    assert jnp.allclose(new_int2, ref_int2, atol=1e-3, rtol=1e-3)
    assert jnp.allclose(new_last2, ref_last2, atol=1e-3, rtol=1e-3)

    print("KERNEL_OK")
</pallas_src>

<mosaic_0001>
module attributes {stable_mosaic.version = 11 : i64} {
  func.func @_pid_kernel(%arg0: i32, %arg1: memref<24x128xf32, #tpu.memory_space<vmem>>, %arg2: memref<24x128xf32, #tpu.memory_space<vmem>>, %arg3: memref<1x128xf32, #tpu.memory_space<vmem>>, %arg4: memref<1x128xf32, #tpu.memory_space<vmem>>, %arg5: memref<384x128xf32, #tpu.memory_space<vmem>>, %arg6: memref<24x128xf32, #tpu.memory_space<vmem>>, %arg7: memref<24x128xf32, #tpu.memory_space<vmem>>, %arg8: memref<24x128xf32, #tpu.memory_space<vmem>>) attributes {dimension_semantics = [#tpu.dimension_semantics<parallel>], iteration_bounds = array<i64: 2>, scalar_prefetch = 0 : i64, scratch_operands = 0 : i64, tpu.core_type = #tpu.core_type<tc>, window_params = [{transform_indices = @transform_0, window_bounds = array<i64: 24, 128>}, {transform_indices = @transform_1, window_bounds = array<i64: 24, 128>}, {pipeline_mode = #tpu.pipeline_mode<synchronous>, transform_indices = @transform_2, window_bounds = array<i64: 1, 128>}, {pipeline_mode = #tpu.pipeline_mode<synchronous>, transform_indices = @transform_3, window_bounds = array<i64: 1, 128>}, {pipeline_mode = #tpu.pipeline_mode<synchronous>, transform_indices = @transform_4, window_bounds = array<i64: 384, 128>}, {transform_indices = @transform_5, window_bounds = array<i64: 24, 128>}, {transform_indices = @transform_6, window_bounds = array<i64: 24, 128>}, {transform_indices = @transform_7, window_bounds = array<i64: 24, 128>}]} {
    %c0 = arith.constant 0 : index
    %c0_0 = arith.constant 0 : index
    %0 = vector.load %arg2[%c0, %c0_0] : memref<24x128xf32, #tpu.memory_space<vmem>>, vector<24x128xf32>
    %c0_1 = arith.constant 0 : index
    %c0_2 = arith.constant 0 : index
    %1 = vector.load %arg1[%c0_1, %c0_2] : memref<24x128xf32, #tpu.memory_space<vmem>>, vector<24x128xf32>
    %2 = arith.subf %0, %1 : vector<24x128xf32>
    %c0_3 = arith.constant 0 : index
    %c0_4 = arith.constant 0 : index
    %3 = vector.load %arg3[%c0_3, %c0_4] : memref<1x128xf32, #tpu.memory_space<vmem>>, vector<1x128xf32>
    %c0_5 = arith.constant 0 : index
    %c0_6 = arith.constant 0 : index
    %4 = vector.load %arg4[%c0_5, %c0_6] : memref<1x128xf32, #tpu.memory_space<vmem>>, vector<1x128xf32>
    %c0_7 = arith.constant 0 : index
    %c0_8 = arith.constant 0 : index
    %5 = vector.load %arg5[%c0_7, %c0_8] : memref<384x128xf32, #tpu.memory_space<vmem>>, vector<128x128xf32>
    %cst = arith.constant dense<0.000000e+00> : vector<24x128xf32>
    %6 = tpu.matmul %2, %5, %cst {dimension_numbers = #tpu.dot_dimension_numbers<[1], [0], [0], [1], [0, 0, 1, 1], [], []>} : vector<24x128xf32>, vector<128x128xf32>, vector<24x128xf32> -> vector<24x128xf32>
    %c128 = arith.constant 128 : index
    %c0_9 = arith.constant 0 : index
    %7 = vector.load %arg5[%c128, %c0_9] : memref<384x128xf32, #tpu.memory_space<vmem>>, vector<128x128xf32>
    %cst_10 = arith.constant dense<0.000000e+00> : vector<1x128xf32>
    %8 = tpu.matmul %3, %7, %cst_10 {dimension_numbers = #tpu.dot_dimension_numbers<[1], [0], [0], [1], [0, 0, 1, 1], [], []>} : vector<1x128xf32>, vector<128x128xf32>, vector<1x128xf32> -> vector<1x128xf32>
    %9 = vector.broadcast %8 : vector<1x128xf32> to vector<24x128xf32>
    %10 = arith.addf %6, %9 : vector<24x128xf32>
    %c256 = arith.constant 256 : index
    %c0_11 = arith.constant 0 : index
    %11 = vector.load %arg5[%c256, %c0_11] : memref<384x128xf32, #tpu.memory_space<vmem>>, vector<128x128xf32>
    %cst_12 = arith.constant dense<0.000000e+00> : vector<1x128xf32>
    %12 = tpu.matmul %4, %11, %cst_12 {dimension_numbers = #tpu.dot_dimension_numbers<[1], [0], [0], [1], [0, 0, 1, 1], [], []>} : vector<1x128xf32>, vector<128x128xf32>, vector<1x128xf32> -> vector<1x128xf32>
    %13 = vector.broadcast %12 : vector<1x128xf32> to vector<24x128xf32>
    %14 = arith.addf %10, %13 : vector<24x128xf32>
    %c0_13 = arith.constant 0 : index
    %c0_14 = arith.constant 0 : index
    %15 = vector.load %arg6[%c0_13, %c0_14] : memref<24x128xf32, #tpu.memory_space<vmem>>, vector<24x128xf32>
    tpu.vector_store %arg6[%c0_13, %c0_14], %14 {strides = array<i32>} : memref<24x128xf32, #tpu.memory_space<vmem>>, vector<24x128xf32>,
    %cst_15 = arith.constant 1.000000e-01 : f32
    %16 = vector.broadcast %cst_15 : f32 to vector<24x128xf32>
    %17 = arith.mulf %2, %16 : vector<24x128xf32>
    %18 = vector.broadcast %3 : vector<1x128xf32> to vector<24x128xf32>
    %19 = arith.addf %18, %17 : vector<24x128xf32>
    %c0_16 = arith.constant 0 : index
    %c0_17 = arith.constant 0 : index
    %20 = vector.load %arg7[%c0_16, %c0_17] : memref<24x128xf32, #tpu.memory_space<vmem>>, vector<24x128xf32>
    tpu.vector_store %arg7[%c0_16, %c0_17], %19 {strides = array<i32>} : memref<24x128xf32, #tpu.memory_space<vmem>>, vector<24x128xf32>,
    %c0_18 = arith.constant 0 : index
    %c0_19 = arith.constant 0 : index
    %21 = vector.load %arg8[%c0_18, %c0_19] : memref<24x128xf32, #tpu.memory_space<vmem>>, vector<24x128xf32>
    tpu.vector_store %arg8[%c0_18, %c0_19], %2 {strides = array<i32>} : memref<24x128xf32, #tpu.memory_space<vmem>>, vector<24x128xf32>,
    return
  }
  func.func @transform_0(%arg0: i32) -> (i32, i32) {
    %c0_i32 = arith.constant 0 : i32
    %c0_i32_0 = arith.constant 0 : i32
    return %arg0, %c0_i32 : i32, i32
  }
  func.func @transform_1(%arg0: i32) -> (i32, i32) {
    %c0_i32 = arith.constant 0 : i32
    %c0_i32_0 = arith.constant 0 : i32
    return %arg0, %c0_i32 : i32, i32
  }
  func.func @transform_2(%arg0: i32) -> (i32, i32) {
    %c0_i32 = arith.constant 0 : i32
    %c0_i32_0 = arith.constant 0 : i32
    %c0_i32_1 = arith.constant 0 : i32
    return %c0_i32, %c0_i32_0 : i32, i32
  }
  func.func @transform_3(%arg0: i32) -> (i32, i32) {
    %c0_i32 = arith.constant 0 : i32
    %c0_i32_0 = arith.constant 0 : i32
    %c0_i32_1 = arith.constant 0 : i32
    return %c0_i32, %c0_i32_0 : i32, i32
  }
  func.func @transform_4(%arg0: i32) -> (i32, i32) {
    %c0_i32 = arith.constant 0 : i32
    %c0_i32_0 = arith.constant 0 : i32
    %c0_i32_1 = arith.constant 0 : i32
    return %c0_i32, %c0_i32_0 : i32, i32
  }
  func.func @transform_5(%arg0: i32) -> (i32, i32) {
    %c0_i32 = arith.constant 0 : i32
    %c0_i32_0 = arith.constant 0 : i32
    return %arg0, %c0_i32 : i32, i32
  }
  func.func @transform_6(%arg0: i32) -> (i32, i32) {
    %c0_i32 = arith.constant 0 : i32
    %c0_i32_0 = arith.constant 0 : i32
    return %arg0, %c0_i32 : i32, i32
  }
  func.func @transform_7(%arg0: i32) -> (i32, i32) {
    %c0_i32 = arith.constant 0 : i32
    %c0_i32_0 = arith.constant 0 : i32
    return %arg0, %c0_i32 : i32, i32
  }
}

</mosaic_0001>

<bundles_post_ra>
// kernel: tpu_custom_call.1
= control target key start
LH: loop header
LB: loop body
LE: loop exit
PB: predicated region body
PF: predicated region fallthrough
CT: control target
= control target key end

     0   :  { %s2036_s0 = inlined_call_operand.hbm [shape: f32[40,128], index: 0, kind: input, shape index: {}]   ;;  %s2037_s1 = inlined_call_operand.hbm [shape: f32[40,128], index: 1, kind: input, shape index: {}]   ;;  %s2038_s2 = inlined_call_operand.vmem [shape: f32[1,128], index: 2, kind: input, shape index: {}]   ;;  %s2039_s3 = inlined_call_operand.vmem [shape: f32[1,128], index: 3, kind: input, shape index: {}]   ;;  %s2040_s4 = inlined_call_operand.hbm [shape: f32[384,128], index: 4, kind: input, shape index: {}]   ;;  %s2041_s5 = inlined_call_operand.hbm [shape: f32[40,128], index: 5, kind: output, shape index: {0}]   ;;  %s2042_s6 = inlined_call_operand.hbm [shape: f32[40,128], index: 6, kind: output, shape index: {1}]   ;;  %s2043_s7 = inlined_call_operand.hbm [shape: f32[40,128], index: 7, kind: output, shape index: {2}]  }
   0x1   :  { %2048 = sst [smem:[#allocation18_spill]] %s2036_s0 }
   0x2   :  { %2049 = sst [smem:[#allocation19_spill]] %s2040_s4 }
   0x3   :  { %13 = vsyncpa [#allocation3], 0 }
   0x4   :  { %15 = vsyncpa [#allocation3 + $0x1], 0 }
   0x5   :  { %16 = vsyncpa [#allocation6], 0 }
   0x6   :  { %18 = vsyncpa [#allocation6 + $0x1], 0 }
   0x7   :  { %19 = vsyncpa [#allocation4], 0 }
   0x8   :  { %21 = vsyncpa [#allocation4 + $0x1], 0 }
   0x9   :  { %22 = vsyncpa [#allocation10], 0 }
   0xa   :  { %24 = vsyncpa [#allocation10 + $0x1], 0  ;;  %s1589_s24 = smov 0   ;;  %s1591_s25 = smov 0  }
   0xb   :  { %s1593_s26 = smov 0   ;;  %s1595_s27 = smov 0  }
   0xc LB: > { %s1610_s28 = sadd.s32 4294967295, %s1526_s27   ;;  %s2047_s29 = sadd.s32 4294967294, %s1526_s27   ;;  %s1526_s27 = sphi %s1595_s27, %s2074_s27   ;;  %s1522_s26 = sphi %s1593_s26, %s2073_s26   ;;  %s1518_s25 = sphi %s1591_s25, %s2072_s25   ;;  %s1514_s24 = sphi %s1589_s24, %s2071_s24  }
   0xd   : > { %s1614_s30 = sadd.s32 1, %s1526_s27   ;;  %s37_s8 = sadd.s32 1, %s1522_s26 }
   0xe   : > { %s34_s9 = ssub.s32 %s1526_s27, %s1614_s30  ;;  %p44_p0 = scmp.ne.s32.totalorder %s1522_s26, %s1518_s25 }
   0xf   : > { %p35_p1 = scmp.eq.s32.totalorder %s34_s9, 0  ;;  %p45_p2 = scmp.eq.s32.totalorder %s1526_s27, 0 }
  0x10   : > { %p50_p3 = scmp.ne.s32.totalorder %s1518_s25, %s1514_s24  ;;  %p2044_p4 = scmp.eq.s32.totalorder %s1610_s28, 0 }
  0x11   : > { %s1626_s10 = scalar_select %p35_p1, %s1522_s26, %s37_s8  }
  0x12   : > { %p1628_p5 = por %p45_p2, %p44_p0  ;;  %p1634_p6 = por %p2044_p4, %p50_p3 }
  0x13   : > { %2050 = sst [smem:[#allocation17_spill]] %s1626_s10  ;;  %p163_p7 = scmp.eq.s32.totalorder %s1610_s28, 1 }
  0x14   : > { %s2051_s11 = scalar_select %p1628_p5, 1, 0 }
  0x15   : > { %s2052_s12 = scalar_select %p1634_p6, 1, 0 }
  0x16   : > { %p169_p8 = scmp.eq.s32.totalorder %s2047_s29, 1  ;;  %p958_p9 = scmp.ge.s32.totalorder %s1526_s27, 1 }
  0x17   : > { %p228_p10 = scmp.lt.s32.totalorder %s1526_s27, 3  ;;  %p1643_p11 = por %p163_p7, %p44_p0 }
  0x18   : > { %p1647_p12 = por %p169_p8, %p50_p3  ;;  %s1528_s16 = smov [#allocation7]  }
  0x19   : > { %s2053_s13 = scalar_select %p1643_p11, 1, 0 }
  0x1a   : > { %s2054_s14 = scalar_select %p1647_p12, 1, 0 }
  0x1b   : > { %p1651_p13 = pnand %p958_p9, %p228_p10  ;;  %s246_s17 = sshll.u32 %s1528_s16, 4  ;;  %s247_s17 = int_to_ptr.vmem [resolvable:$true] %s246_s17 }
  0x1c   : > { %s2057_s4 = sld [smem:[#allocation19_spill]] }
  0x1d   : > { %s2055_s15 = scalar_select %p1651_p13, 1, 0 }
  0x1e   : > { %p1243_p1 = pneg %p1651_p13 }
  0x20   : > { %p1659_p2 = pnand %p1243_p1, %p2044_p4 }
  0x22   : > { %s1308_s21 = scalar_lea.hbm %s2057_s4, 6144  ;;  %p1310_p3 = pneg %p1659_p2 }
  0x23   : > { %p1309_p0 = scmp.ne.s32.totalorder %s2057_s4, %s1308_s21  ;;  %p1315_p9 = scmp.lt.u32.totalorder %s1308_s21, %s2057_s4 }
  0x25   : > { %p1311_p7 = pnand %p1310_p3, %p1309_p0 }
  0x27   : > { %p1312_p8 = pneg %p1311_p7 }
  0x29   : > { %p1317_p10 = pnand %p1315_p9, %p1312_p8 }
  0x2b   : > { %1320 = shalt.err (!%p1317_p10)
}
  0x2c   : > { %s1321_s16 = scalar_lea.vmem %s247_s17, 6144  ;;  %p1329_p11 = scmp.lt.s32.totalorder %s247_s17, %s247_s17 }
  0x2d   : > { %p1322_p1 = scmp.ne.s32.totalorder %s247_s17, %s1321_s16  ;;  %p1330_p6 = scmp.lt.s32.totalorder %s1321_s16, %s1321_s16 }
  0x2f   : > { %p1324_p4 = pnand %p1322_p1, %p1310_p3  ;;  %p1331_p13 = por %p1330_p6, %p1329_p11 }
  0x31   : > { %p1325_p12 = pneg %p1324_p4 }
  0x33   : > { %p1332_p5 = pnand %p1331_p13, %p1325_p12 }
  0x35   : > { %1335 = shalt.err (!%p1332_p5)
}
  0x36   : > { %s1529_s19 = smov 128   ;;  %s1530_s20 = smov 8  }
  0x37   : > { %1246 = dma.hbm_to_vmem [thread:$0]  (!%p1659_p2), %s2057_s4, 6144, %s247_s17, [#allocation6], %s1529_s19, %s1529_s19, %s1530_s20  }
  0x38   : > { %p960_p0 = scmp.ge.s32.totalorder %s1526_s27, 2 }
  0x39   : > { %p2058_p4 = scmp.ne.s32.totalorder (!%p960_p0), %s2051_s11, 0 }
  0x3a   : > { %256 = sbr.rel (%p960_p0) target bundleno = 142 (0x8e), region = 28 }
  0x41   : > { %259 = sbr.rel (!%p2058_p4) target bundleno = 105 (0x69), region = 32  ;;  %s260_s21 = sand.u32 (%p2058_p4), 1, %s1522_s26  }
  0x42   : > { %s265_s8 = smul.u32 (%p2058_p4), 3, %s1526_s27  ;;  %s1689_s19 = scalar_lea.sflag (%p2058_p4), [#allocation3], %s260_s21 }
  0x43   : > { %s1231_s9 = smul.u32 (%p2058_p4), 24, %s260_s21 }
  0x44   : > { %s266_s16 = ssub.s32 (%p2058_p4), 5, %s265_s8 }
  0x45   : > { %p267_p5 = scmp.lt.s32.totalorder (%p2058_p4), %s266_s16, 3  ;;  %s264_s20 = scalar_lea.vmem (%p2058_p4), [#allocation2], %s1231_s9 }
  0x48   : > { %s2076_s16 = smov (!%p267_p5, %s266_s16), 3 }
  0x49   : > { %s1686_s18 = sshll.u32 %s2076_s16, 7 }
  0x4a   : > { %s271_s17 = ssub.s32 384, %s1686_s18 }
  0x4b   : > { %272 = vsyncadd %s1689_s19, %s271_s17  ;;  %p962_p6 = scmp.ne.s32.totalorder %s1686_s18, 0  ;;  %s990_s22 = smul.u32 384, %s1526_s27 }
  0x4c   : > { %s277_s23 = sshll.u32 %s264_s20, 4  ;;  %s2059_s0 = sld [smem:[#allocation18_spill]]  ;;  %s1699_s23 = int_to_ptr.vmem [resolvable:$true] %s277_s23 }
  0x52   : > { %s1697_s4 = scalar_lea.hbm %s2059_s0, %s990_s22  ;;  %s1340_s17 = scalar_lea.hbm %s2059_s0, 640 }
  0x53   : > { %s1336_s21 = scalar_lea.hbm %s1697_s4, %s1686_s18  ;;  %p1341_p2 = scmp.lt.u32.totalorder %s1697_s4, %s2059_s0 }
  0x54   : > { %p1337_p11 = scmp.ne.s32.totalorder %s1697_s4, %s1336_s21  ;;  %p1342_p3 = scmp.lt.u32.totalorder %s1340_s17, %s1336_s21 }
  0x55   : > { %p1344_p8 = scmp.lt.u32.totalorder %s1336_s21, %s1697_s4 }
  0x56   : > { %p1338_p12 = pnand %p1337_p11, %p962_p6  ;;  %p1343_p7 = por %p1342_p3, %p1341_p2 }
  0x58   : > { %p1339_p13 = pneg %p1338_p12  ;;  %p1345_p9 = por %p1344_p8, %p1343_p7 }
  0x5a   : > { %p1346_p10 = pnand %p1345_p9, %p1339_p13 }
  0x5c   : > { %1349 = shalt.err (!%p1346_p10)
}
  0x5d   : > { %s1350_s29 = scalar_lea.vmem %s1699_s23, %s1686_s18  ;;  %s1531_s22 = smov [#allocation2]  }
  0x5e   : > { %p1351_p1 = scmp.ne.s32.totalorder %s1699_s23, %s1350_s29  ;;  %s1354_s8 = sshll.u32 %s1531_s22, 4  ;;  %s1355_s8 = int_to_ptr.vmem [resolvable:$false] %s1354_s8 }
  0x5f   : > { %s1356_s10 = scalar_lea.vmem %s1355_s8, 768  ;;  %p1357_p11 = scmp.lt.s32.totalorder %s1699_s23, %s1355_s8 }
  0x60   : > { %p1352_p4 = pnand %p1351_p1, %p962_p6  ;;  %p1358_p12 = scmp.lt.s32.totalorder %s1356_s10, %s1350_s29 }
  0x62   : > { %p1353_p5 = pneg %p1352_p4  ;;  %p1359_p2 = por %p1358_p12, %p1357_p11 }
  0x64   : > { %p1360_p3 = pnand %p1359_p2, %p1353_p5 }
  0x66   : > { %1363 = shalt.err (!%p1360_p3)
}
  0x67   : > { %s1532_s21 = smov 128   ;;  %s1533_s9 = smov 8  }
  0x68   : > { %283 = dma.hbm_to_vmem [thread:$0]  (%p962_p6), %s1697_s4, %s1686_s18, %s1699_s23, %s1689_s19, %s1532_s21, %s1532_s21, %s1533_s9  }
  0x69 PF: > { %p2060_p13 = scmp.ne.s32.totalorder %s2051_s11, 0 }
  0x6a   : > { %s287_s16 = sand.u32 (%p2060_p13), 1, %s1526_s27   ;;  %s289_s17 = sand.u32 (%p2060_p13), 1, %s1522_s26  }
  0x6b   : > { %286 = sbr.rel (!%p2060_p13) target bundleno = 142 (0x8e), region = 36  ;;  %s1734_s0 = scalar_lea.sflag (%p2060_p13), [#allocation6], %s287_s16 }
  0x6c   : > { %s1232_s20 = smul.u32 (%p2060_p13), 24, %s289_s17 }
  0x6d   : > { %s292_s29 = smul.u32 (%p2060_p13), 3, %s1526_s27 }
  0x6e   : > { %s291_s4 = scalar_lea.vmem (%p2060_p13), [#allocation5], %s1232_s20 }
  0x6f   : > { %s293_s22 = ssub.s32 (%p2060_p13), 5, %s292_s29 }
  0x70   : > { %p294_p7 = scmp.lt.s32.totalorder (%p2060_p13), %s293_s22, 3 }
  0x72   : > { %s2078_s22 = smov (!%p294_p7, %s293_s22), 3 }
  0x73   : > { %s1731_s8 = sshll.u32 %s2078_s22, 7 }
  0x74   : > { %s298_s10 = ssub.s32 384, %s1731_s8 }
  0x75   : > { %299 = vsyncadd %s1734_s0, %s298_s10  ;;  %p967_p6 = scmp.ne.s32.totalorder %s1731_s8, 0  ;;  %s991_s11 = smul.u32 384, %s1526_s27 }
  0x76   : > { %s304_s18 = sshll.u32 %s291_s4, 4  ;;  %s1368_s20 = scalar_lea.hbm %s2037_s1, 640  ;;  %s1744_s18 = int_to_ptr.vmem [resolvable:$true] %s304_s18 }
  0x77   : > { %s1742_s21 = scalar_lea.hbm %s2037_s1, %s991_s11 }
  0x78   : > { %s1364_s9 = scalar_lea.hbm %s1742_s21, %s1731_s8  ;;  %p1369_p1 = scmp.lt.u32.totalorder %s1742_s21, %s2037_s1 }
  0x79   : > { %p1365_p8 = scmp.ne.s32.totalorder %s1742_s21, %s1364_s9  ;;  %p1370_p4 = scmp.lt.u32.totalorder %s1368_s20, %s1364_s9 }
  0x7a   : > { %p1372_p11 = scmp.lt.u32.totalorder %s1364_s9, %s1742_s21 }
  0x7b   : > { %p1366_p9 = pnand %p1365_p8, %p967_p6  ;;  %p1371_p5 = por %p1370_p4, %p1369_p1 }
  0x7d   : > { %p1367_p10 = pneg %p1366_p9  ;;  %p1373_p12 = por %p1372_p11, %p1371_p5 }
  0x7f   : > { %p1374_p2 = pnand %p1373_p12, %p1367_p10 }
  0x81   : > { %1377 = shalt.err (!%p1374_p2)
}
  0x82   : > { %s1378_s10 = scalar_lea.vmem %s1744_s18, %s1731_s8  ;;  %s1534_s4 = smov [#allocation5]  }
  0x83   : > { %p1379_p3 = scmp.ne.s32.totalorder %s1744_s18, %s1378_s10  ;;  %s1382_s11 = sshll.u32 %s1534_s4, 4  ;;  %s1383_s11 = int_to_ptr.vmem [resolvable:$false] %s1382_s11 }
  0x84   : > { %s1384_s19 = scalar_lea.vmem %s1383_s11, 768  ;;  %p1385_p8 = scmp.lt.s32.totalorder %s1744_s18, %s1383_s11 }
  0x85   : > { %p1380_p13 = pnand %p1379_p3, %p967_p6  ;;  %p1386_p9 = scmp.lt.s32.totalorder %s1384_s19, %s1378_s10 }
  0x87   : > { %p1381_p7 = pneg %p1380_p13  ;;  %p1387_p1 = por %p1386_p9, %p1385_p8 }
  0x89   : > { %p1388_p4 = pnand %p1387_p1, %p1381_p7 }
  0x8b   : > { %1391 = shalt.err (!%p1388_p4)
}
  0x8c   : > { %s1535_s23 = smov 128   ;;  %s1536_s9 = smov 8  }
  0x8d   : > { %310 = dma.hbm_to_vmem [thread:$0]  (%p967_p6), %s1742_s21, %s1731_s8, %s1744_s18, %s1734_s0, %s1535_s23, %s1535_s23, %s1536_s9  }
  0x8e PF: > { %p2061_p10 = scmp.ne.s32.totalorder %s2055_s15, 0 }
  0x8f   : > { %s1774_s16 = sand.u32 (!%p2061_p10), 1, %s1518_s25   ;;  %p2062_p5 = scmp.ne.s32.totalorder (!%p2061_p10), %s2052_s12, 0 }
  0x90   : > { %316 = sbr.rel (%p2061_p10) target bundleno = 544 (0x220), region = 40  ;;  %s319_s20 = scalar_lea.sflag (!%p2061_p10), [#allocation3], %s1774_s16 }
  0x91   : > { %s1777_s17 = smul.u32 (!%p2061_p10), 24, %s1774_s16 }
  0x93   : > { %s1781_s29 = scalar_lea.vmem (!%p2061_p10), [#allocation2], %s1777_s17 }
  0x97   : > { %1493 = dma.done.wait (%p2062_p5), %s319_s20, 384  }
  0x98   : > { %1495 = vsyncadd (%p2062_p5), %s319_s20, 4294966912  ;;  %s327_s0 = sand.u32 1, %s1610_s28   ;;  %s1791_s8 = scalar_lea.vmem [#allocation5], %s1777_s17 }
  0x99   : > { %s328_s15 = scalar_lea.sflag [#allocation6], %s327_s0 }
  0x9a   : > { %1497 = dma.done.wait (%p2062_p5), %s328_s15, 384  }
  0x9b   : > { %1499 = vsyncadd (%p2062_p5), %s328_s15, 4294966912  ;;  %p2063_p6 = scmp.eq.s32.totalorder %s1610_s28, 0 }
  0x9d   : > { %1501 = dma.done.wait (%p2063_p6), [#allocation6], 6144   ;;  %p2064_p11 = pmov %p2063_p6 }
  0x9e   : > { %v1537_v0 = vmov 0.0|0.0   ;;  %vm1538_vm0 = vmmov 0   ;;  %v1539_v1 = vmov 0.0   ;;  %v433_v2 = vld [vmem:[#allocation7 + $0x80] sm:$0xff]  ;;  %v434_v3 = vld [vmem:[#allocation7 + $0x88] sm:$0xff]  ;;  %v435_v7 = vld [vmem:[#allocation7 + $0x90] sm:$0xff]  ;;  %v519_v12 = vlaneseq }
  0x9f   : > { %1503 = vsyncadd (%p2064_p11), [#allocation6], 4294961152  ;;  %1159 = vmatprep.subr.bf16.mxu0 %v1537_v0  ;;  %1183 = vmatprep.subr.bf16.mxu1 %v1537_v0  ;;  %v417_v4 = vld [vmem:[#allocation7] sm:$0xff]  ;;  %v1160_v5 = vpack.c.bf16 %v434_v3, %v433_v2  ;;  %v418_v6 = vld [vmem:[#allocation7 + $0x8] sm:$0xff]  ;;  %s1833_s21 = scalar_lea.vmem [#allocation11], %s1777_s17  ;;  %s1849_s22 = scalar_lea.vmem [#allocation9], %s1777_s17 }
  0xa0   : > { %1080 = vmatprep.mubr.msk.f32.mxu0 %vm1538_vm0, %v1539_v1  ;;  %1115 = vmatprep.mubr.msk.f32.mxu1 %vm1538_vm0, %v1539_v1  ;;  %v436_v8 = vld [vmem:[#allocation7 + $0x98] sm:$0xff]  ;;  %v1184_v9 = vpack.c.bf16 %v418_v6, %v417_v4  ;;  %v419_v10 = vld [vmem:[#allocation7 + $0x10] sm:$0xff]  ;;  %v437_v15 = vld [vmem:[#allocation7 + $0xa0] sm:$0xff]  ;;  %v520_v19 = vshrl.u32 %v519_v12, 7  ;;  %s366_s11 = scalar_lea.vmem [#allocation8], %s1777_s17  ;;  %s718_s19 = scalar_lea.sflag [#allocation4], %s1774_s16 }
  0xa1   : > { %v420_v11 = vld [vmem:[#allocation7 + $0x18] sm:$0xff]  ;;  %1161 = vmatpush3.bf16.msra.mxu0 %v1160_v5  ;;  %v1163_v13 = vpack.c.bf16 %v436_v8, %v435_v7  ;;  %v438_v16 = vld [vmem:[#allocation7 + $0xa8] sm:$0xff]  ;;  %v421_v17 = vld [vmem:[#allocation7 + $0x20] sm:$0xff]  ;;  %s1887_s23 = scalar_lea.sflag [#allocation10], %s327_s0  ;;  %p2065_p12 = scmp.ne.s32.totalorder %s2053_s13, 0 }
  0xa2   : > { %1185 = vmatpush3.bf16.msra.mxu1 %v1184_v9  ;;  %1162 = vmatprep.subr.bf16.mxu0 %v1537_v0  ;;  %v1187_v14 = vpack.c.bf16 %v420_v11, %v419_v10  ;;  %v422_v18 = vld [vmem:[#allocation7 + $0x28] sm:$0xff]  ;;  %v1166_v20 = vpack.c.bf16 %v438_v16, %v437_v15  ;;  %v439_v22 = vld [vmem:[#allocation7 + $0xb0] sm:$0xff]  ;;  %v440_v23 = vld [vmem:[#allocation7 + $0xb8] sm:$0xff]  ;;  %v1811_v27 = vsub.s32 0, %v520_v19  ;;  %s735_s9 = smul.u32 (%p2065_p12), 3, %s1610_s28 }
  0xa3   : > { %1186 = vmatprep.subr.bf16.mxu1 %v1537_v0  ;;  %v1190_v21 = vpack.c.bf16 %v422_v18, %v421_v17  ;;  %v423_v24 = vld [vmem:[#allocation7 + $0x30] sm:$0xff]  ;;  %v424_v25 = vld [vmem:[#allocation7 + $0x38] sm:$0xff]  ;;  %v441_v26 = vld [vmem:[#allocation7 + $0xc0] sm:$0xff]  ;;  %v1169_v28 = vpack.c.bf16 %v440_v23, %v439_v22 }
  0xa4   : > { %v1816_v29 = vld [vmem:[%s2038_s2] sm:$0x1]  ;;  %v406_v30 = vld [vmem:[%s1791_s8] sm:$0xff]  ;;  %v1193_v32 = vpack.c.bf16 %v424_v25, %v423_v24  ;;  %v407_v36 = vld [vmem:[%s1791_s8 + $0x8] sm:$0xff]  ;;  %s736_s20 = ssub.s32 (%p2065_p12), 5, %s735_s9 }
  0xa5   : > { %1164 = vmatpush3.bf16.msra.mxu0 %v1163_v13  ;;  %v409_v31 = vld [vmem:[%s1781_s29] sm:$0xff]  ;;  %v442_v33 = vld [vmem:[#allocation7 + $0xc8] sm:$0xff]  ;;  %v706_v34 = vrot.slane %v1816_v29, %v1811_v27  ;;  %v443_v48 = vld [vmem:[#allocation7 + $0xd0] sm:$0xff]  ;;  %p737_p2 = scmp.lt.s32.totalorder (%p2065_p12), %s736_s20, 3 }
  0xa6   : > { %1188 = vmatpush3.bf16.msra.mxu1 %v1187_v14  ;;  %1165 = vmatprep.subr.bf16.mxu0 %v1537_v0  ;;  %v1823_v35 = vsub.f32 %v406_v30, %v409_v31  ;;  %v410_v37 = vld [vmem:[%s1781_s29 + $0x8] sm:$0xff]  ;;  %v408_v41 = vld [vmem:[%s1791_s8 + $0x10] sm:$0xff]  ;;  %v411_v43 = vld [vmem:[%s1781_s29 + $0x10] sm:$0xff]  ;;  %v1172_v44 = vpack.c.bf16 %v442_v33, %v441_v26 }
  0xa7   : > { %1189 = vmatprep.subr.bf16.mxu1 %v1537_v0  ;;  %v425_v38 = vld [vmem:[#allocation7 + $0x40] sm:$0xff]  ;;  %v426_v39 = vld [vmem:[#allocation7 + $0x48] sm:$0xff]  ;;  %v1828_v40 = vsub.f32 %v407_v36, %v410_v37  ;;  %v1841_v46 = vsub.f32 %v408_v41, %v411_v43  ;;  %v444_v49 = vld [vmem:[#allocation7 + $0xd8] sm:$0xff] }
  0xa8   : > { %v699_v42 = vmul.f32 0.1, %v1823_v35  ;;  %714 = vst [vmem:[%s1833_s21] sm:$0xff] %v1823_v35  ;;  %v1196_v47 = vpack.c.bf16 %v426_v39, %v425_v38  ;;  %v427_v51 = vld [vmem:[#allocation7 + $0x50] sm:$0xff]  ;;  %v428_v52 = vld [vmem:[#allocation7 + $0x58] sm:$0xff]  ;;  %v1175_v55 = vpack.c.bf16 %v444_v49, %v443_v48  ;;  %v445_v58 = vld [vmem:[#allocation7 + $0xe0] sm:$0xff] }
  0xa9   : > { %1167 = vmatpush3.bf16.msra.mxu0 %v1166_v20  ;;  %v700_v45 = vmul.f32 0.1, %v1828_v40  ;;  %715 = vst [vmem:[%s1833_s21 + $0x8] sm:$0xff] %v1828_v40  ;;  %v701_v54 = vmul.f32 0.1, %v1841_v46  ;;  %716 = vst [vmem:[%s1833_s21 + $0x10] sm:$0xff] %v1841_v46  ;;  %v1199_v57 = vpack.c.bf16 %v428_v52, %v427_v51 }
  0xaa   : > { %1191 = vmatpush3.bf16.msra.mxu1 %v1190_v21  ;;  %1168 = vmatprep.subr.bf16.mxu0 %v1537_v0  ;;  %v708_v50 = vadd.f32 %v706_v34, %v699_v42  ;;  %v446_v59 = vld [vmem:[#allocation7 + $0xe8] sm:$0xff]  ;;  %v429_v60 = vld [vmem:[#allocation7 + $0x60] sm:$0xff]  ;;  %v447_v2 = vld [vmem:[#allocation7 + $0xf0] sm:$0xff] }
  0xab   : > { %1192 = vmatprep.subr.bf16.mxu1 %v1537_v0  ;;  %v709_v53 = vadd.f32 %v706_v34, %v700_v45  ;;  %v710_v56 = vadd.f32 %v706_v34, %v701_v54  ;;  %v430_v61 = vld [vmem:[#allocation7 + $0x68] sm:$0xff]  ;;  %v1178_v62 = vpack.c.bf16 %v446_v59, %v445_v58  ;;  %v448_v3 = vld [vmem:[#allocation7 + $0xf8] sm:$0xff]  ;;  %v431_v4 = vld [vmem:[#allocation7 + $0x70] sm:$0xff] }
  0xac   : > { %711 = vst [vmem:[%s1849_s22] sm:$0xff] %v708_v50  ;;  %v1202_v63 = vpack.c.bf16 %v430_v61, %v429_v60  ;;  %v432_v5 = vld [vmem:[#allocation7 + $0x78] sm:$0xff]  ;;  %v1181_v6 = vpack.c.bf16 %v448_v3, %v447_v2  ;;  %v603_v8 = vld [vmem:[#allocation7 + $0x100] sm:$0xff]  ;;  %v604_v9 = vld [vmem:[#allocation7 + $0x108] sm:$0xff] }
  0xad   : > { %1170 = vmatpush3.bf16.msra.mxu0 %v1169_v28  ;;  %712 = vst [vmem:[%s1849_s22 + $0x8] sm:$0xff] %v709_v53  ;;  %713 = vst [vmem:[%s1849_s22 + $0x10] sm:$0xff] %v710_v56  ;;  %v1205_v7 = vpack.c.bf16 %v432_v5, %v431_v4  ;;  %v1208_v10 = vpack.c.bf16 %v604_v9, %v603_v8  ;;  %v605_v11 = vld [vmem:[#allocation7 + $0x110] sm:$0xff]  ;;  %v606_v12 = vld [vmem:[#allocation7 + $0x118] sm:$0xff] }
  0xae   : > { %1194 = vmatpush3.bf16.msra.mxu1 %v1193_v32  ;;  %1171 = vmatprep.subr.bf16.mxu0 %v1537_v0  ;;  %v1211_v13 = vpack.c.bf16 %v606_v12, %v605_v11  ;;  %v607_v14 = vld [vmem:[#allocation7 + $0x120] sm:$0xff]  ;;  %v608_v15 = vld [vmem:[#allocation7 + $0x128] sm:$0xff]  ;;  %v609_v17 = vld [vmem:[#allocation7 + $0x130] sm:$0xff] }
  0xaf   : > { %1195 = vmatprep.subr.bf16.mxu1 %v1537_v0  ;;  %v1214_v16 = vpack.c.bf16 %v608_v15, %v607_v14  ;;  %v610_v18 = vld [vmem:[#allocation7 + $0x138] sm:$0xff]  ;;  %v611_v20 = vld [vmem:[#allocation7 + $0x140] sm:$0xff]  ;;  %v612_v21 = vld [vmem:[#allocation7 + $0x148] sm:$0xff] }
  0xb0   : > { %v1217_v19 = vpack.c.bf16 %v610_v18, %v609_v17  ;;  %v1220_v22 = vpack.c.bf16 %v612_v21, %v611_v20  ;;  %v613_v23 = vld [vmem:[#allocation7 + $0x150] sm:$0xff]  ;;  %v614_v24 = vld [vmem:[#allocation7 + $0x158] sm:$0xff]  ;;  %v615_v25 = vld [vmem:[#allocation7 + $0x160] sm:$0xff] }
  0xb1   : > { %1173 = vmatpush3.bf16.msra.mxu0 %v1172_v44  ;;  %v616_v26 = vld [vmem:[#allocation7 + $0x168] sm:$0xff]  ;;  %v618_v30 = vld [vmem:[#allocation7 + $0x178] sm:$0xff]  ;;  %v416_v32 = vld [vmem:[%s2039_s3] sm:$0x1] }
  0xb2   : > { %1197 = vmatpush3.bf16.msra.mxu1 %v1196_v47  ;;  %1174 = vmatprep.subr.bf16.mxu0 %v1537_v0  ;;  %v1226_v28 = vpack.c.bf16 %v616_v26, %v615_v25 }
  0xb3   : > { %1198 = vmatprep.subr.bf16.mxu1 %v1537_v0 }
  0xb5   : > { %1176 = vmatpush3.bf16.msra.mxu0 %v1175_v55 }
  0xb6   : > { %1200 = vmatpush3.bf16.msra.mxu1 %v1199_v57  ;;  %1177 = vmatprep.subr.bf16.mxu0 %v1537_v0 }
  0xb7   : > { %1201 = vmatprep.subr.bf16.mxu1 %v1537_v0 }
  0xb9   : > { %1179 = vmatpush3.bf16.msra.mxu0 %v1178_v62 }
  0xba   : > { %1203 = vmatpush3.bf16.msra.mxu1 %v1202_v63  ;;  %1180 = vmatprep.subr.bf16.mxu0 %v1537_v0 }
  0xbb   : > { %1204 = vmatprep.subr.bf16.mxu1 %v1537_v0 }
  0xbd   : > { %1182 = vmatpush3.bf16.msra.mxu0 %v1181_v6 }
  0xbe   : > { %1206 = vmatpush3.bf16.msra.mxu1 %v1205_v7  ;;  %1207 = vmatprep.subr.bf16.mxu0 %v1537_v0 }
  0xc0   : > { %1081 = vmatmul.mubr.f32.vlgmr.msra.gmra.mrb[0].mxu0 %v1816_v29  ;;  %v617_v29 = vld [vmem:[#allocation7 + $0x170] sm:$0xff] }
  0xc1   : > { %1116 = vmatmul.mubr.f32.vlgmr.msra.gmra.mrb[0].mxu1 %v1823_v35  ;;  %1209 = vmatpush3.bf16.msra.mxu0 %v1208_v10  ;;  %v1229_v31 = vpack.c.bf16 %v618_v30, %v617_v29 }
  0xc2   : > { %1118 = vmatprep.mubr.msk.f32.mxu1 %vm1538_vm0, %v1539_v1  ;;  %1210 = vmatprep.subr.bf16.mxu0 %v1537_v0 }
  0xc3   : > { %1156 = vmatprep.mubr.msk.f32.mxu0 %vm1538_vm0, %v1539_v1 }
  0xc5   : > { %1119 = vmatmul.mubr.f32.gmra.mrb[2].mxu1 %v1828_v40  ;;  %1212 = vmatpush3.bf16.msra.mxu0 %v1211_v13 }
  0xc6   : > { %1121 = vmatprep.mubr.msk.f32.mxu1 %vm1538_vm0, %v1539_v1  ;;  %1213 = vmatprep.subr.bf16.mxu0 %v1537_v0  ;;  %v1223_v1 = vpack.c.bf16 %v614_v24, %v613_v23 }
  0xc9   : > { %1122 = vmatmul.mubr.f32.gmra.mrb[4].mxu1 %v1841_v46  ;;  %1215 = vmatpush3.bf16.msra.mxu0 %v1214_v16 }
  0xca   : > { %1216 = vmatprep.subr.bf16.mxu0 %v1537_v0 }
  0xcd   : > { %1218 = vmatpush3.bf16.msra.mxu0 %v1217_v19 }
  0xce   : > { %1219 = vmatprep.subr.bf16.mxu0 %v1537_v0 }
  0xd1   : > { %1221 = vmatpush3.bf16.msra.mxu0 %v1220_v22 }
  0xd2   : > { %1222 = vmatprep.subr.bf16.mxu0 %v1537_v0 }
  0xd5   : > { %1224 = vmatpush3.bf16.msra.mxu0 %v1223_v1 }
  0xd6   : > { %1225 = vmatprep.subr.bf16.mxu0 %v1537_v0 }
  0xd9   : > { %1227 = vmatpush3.bf16.msra.mxu0 %v1226_v28 }
  0xda   : > { %1228 = vmatprep.subr.bf16.mxu0 %v1537_v0 }
  0xdd   : > { %1230 = vmatpush3.bf16.msra.mxu0 %v1229_v31 }
  0xe0   : > { %1157 = vmatmul.mubr.f32.vlgmr.msra.gmra.mrb[2].mxu0 %v416_v32 }
 0x193   : > { %v515_v33 = vpop.f32.mrb[0].mxu0 }
 0x194   : > { %v522_v34 = vrot.slane %v515_v33, %v1811_v27  ;;  %v1082_v35 = vpop.f32.mrb[1].mxu0  ;;  %v589_v36 = vpop.f32.mrb[0].mxu1 }
 0x195   : > { %v1117_v37 = vpop.f32.mrb[1].mxu1 }
 0x196   : > { %v590_v38 = vadd.f32 %v589_v36, %v522_v34 }
 0x198   : > { %v594_v39 = vpop.f32.mrb[2].mxu1 }
 0x199   : > { %v595_v40 = vadd.f32 %v594_v39, %v522_v34  ;;  %v1120_v41 = vpop.f32.mrb[3].mxu1 }
 0x19c   : > { %v599_v0 = vpop.f32.mrb[4].mxu1 }
 0x19d   : > { %v600_v42 = vadd.f32 %v599_v0, %v522_v34  ;;  %v1123_v43 = vpop.f32.mrb[5].mxu1 }
 0x1b3   : > { %v685_v44 = vpop.f32.mrb[2].mxu0  ;;  %734 = sbr.rel (!%p2065_p12) target bundleno = 470 (0x1d6), region = 56 }
 0x1b4   : > { %v692_v45 = vrot.slane %v685_v44, %v1811_v27  ;;  %v1158_v46 = vpop.f32.mrb[3].mxu0 }
 0x1b6   : > { %v693_v47 = vadd.f32 %v692_v45, %v590_v38  ;;  %v694_v48 = vadd.f32 %v692_v45, %v595_v40  ;;  %v695_v49 = vadd.f32 %v692_v45, %v600_v42 }
 0x1b8   : > { %696 = vst [vmem:[%s366_s11] sm:$0xff] %v693_v47  ;;  %697 = vst [vmem:[%s366_s11 + $0x8] sm:$0xff] %v694_v48 }
 0x1b9   : > { %698 = vst [vmem:[%s366_s11 + $0x10] sm:$0xff] %v695_v49 }
 0x1ba   : > { %s2080_s20 = smov (!%p737_p2, %s736_s20), 3 }
 0x1bb   : > { %s1892_s29 = sshll.u32 %s2080_s20, 7 }
 0x1bc   : > { %s741_s17 = ssub.s32 384, %s1892_s29 }
 0x1bd   : > { %742 = vsyncadd %s718_s19, %s741_s17  ;;  %p974_p3 = scmp.ne.s32.totalorder %s1892_s29, 0  ;;  %s992_s0 = smul.u32 384, %s1610_s28 }
 0x1be   : > { %s747_s15 = sshll.u32 %s366_s11, 4  ;;  %s1540_s4 = smov [#allocation8]   ;;  %s1904_s15 = int_to_ptr.vmem [resolvable:$true] %s747_s15 }
 0x1bf   : > { %s1902_s18 = scalar_lea.hbm %s2041_s5, %s992_s0  ;;  %s1392_s10 = scalar_lea.vmem %s1904_s15, %s1892_s29 }
 0x1c0   : > { %p1393_p13 = scmp.ne.s32.totalorder %s1904_s15, %s1392_s10  ;;  %s1396_s9 = sshll.u32 %s1540_s4, 4  ;;  %s1397_s9 = int_to_ptr.vmem [resolvable:$false] %s1396_s9 }
 0x1c1   : > { %s1398_s20 = scalar_lea.vmem %s1397_s9, 768  ;;  %p1399_p9 = scmp.lt.s32.totalorder %s1904_s15, %s1397_s9 }
 0x1c2   : > { %p1394_p7 = pnand %p1393_p13, %p974_p3  ;;  %p1400_p1 = scmp.lt.s32.totalorder %s1398_s20, %s1392_s10 }
 0x1c4   : > { %p1395_p8 = pneg %p1394_p7  ;;  %p1401_p4 = por %p1400_p1, %p1399_p9 }
 0x1c6   : > { %p1402_p10 = pnand %p1401_p4, %p1395_p8 }
 0x1c8   : > { %1405 = shalt.err (!%p1402_p10)
}
 0x1c9   : > { %s1406_s11 = scalar_lea.hbm %s1902_s18, %s1892_s29  ;;  %s1410_s8 = scalar_lea.hbm %s2041_s5, 640 }
 0x1ca   : > { %p1407_p5 = scmp.ne.s32.totalorder %s1902_s18, %s1406_s11  ;;  %p1411_p12 = scmp.lt.u32.totalorder %s1902_s18, %s2041_s5 }
 0x1cb   : > { %p1412_p2 = scmp.lt.u32.totalorder %s1410_s8, %s1406_s11  ;;  %p1414_p7 = scmp.lt.u32.totalorder %s1406_s11, %s1902_s18 }
 0x1cc   : > { %p1408_p6 = pnand %p1407_p5, %p974_p3 }
 0x1cd   : > { %p1413_p13 = por %p1412_p2, %p1411_p12 }
 0x1ce   : > { %p1409_p11 = pneg %p1408_p6 }
 0x1cf   : > { %p1415_p8 = por %p1414_p7, %p1413_p13 }
 0x1d1   : > { %p1416_p9 = pnand %p1415_p8, %p1409_p11 }
 0x1d3   : > { %1419 = shalt.err (!%p1416_p9)
}
 0x1d4   : > { %s1541_s4 = smov 128   ;;  %s1542_s9 = smov 8  }
 0x1d5   : > { %753 = dma.vmem_to_hbm [thread:$0]  (%p974_p3), %s1904_s15, %s1892_s29, %s1902_s18, %s718_s19, %s1541_s4, %s1541_s4, %s1542_s9  }
 0x1d6 PF: > { %p2066_p1 = scmp.ne.s32.totalorder %s2053_s13, 0 }
 0x1d7   : > { %s757_s20 = smul.u32 (%p2066_p1), 3, %s1610_s28 }
 0x1d8   : > { %756 = sbr.rel (!%p2066_p1) target bundleno = 507 (0x1fb), region = 60 }
 0x1d9   : > { %s758_s11 = ssub.s32 (%p2066_p1), 5, %s757_s20 }
 0x1da   : > { %p759_p4 = scmp.lt.s32.totalorder (%p2066_p1), %s758_s11, 3 }
 0x1df   : > { %s2082_s11 = smov (!%p759_p4, %s758_s11), 3 }
 0x1e0   : > { %s1935_s17 = sshll.u32 %s2082_s11, 7 }
 0x1e1   : > { %s763_s0 = ssub.s32 384, %s1935_s17 }
 0x1e2   : > { %764 = vsyncadd %s1887_s23, %s763_s0  ;;  %p979_p3 = scmp.ne.s32.totalorder %s1935_s17, 0  ;;  %s993_s16 = smul.u32 384, %s1610_s28 }
 0x1e3   : > { %s769_s19 = sshll.u32 %s1849_s22, 4  ;;  %s1543_s12 = smov [#allocation9]   ;;  %s1947_s19 = int_to_ptr.vmem [resolvable:$true] %s769_s19 }
 0x1e4   : > { %s1945_s18 = scalar_lea.hbm %s2042_s6, %s993_s16  ;;  %s1420_s8 = scalar_lea.vmem %s1947_s19, %s1935_s17 }
 0x1e5   : > { %p1421_p10 = scmp.ne.s32.totalorder %s1947_s19, %s1420_s8  ;;  %s1424_s10 = sshll.u32 %s1543_s12, 4  ;;  %s1425_s10 = int_to_ptr.vmem [resolvable:$false] %s1424_s10 }
 0x1e6   : > { %s1426_s4 = scalar_lea.vmem %s1425_s10, 768  ;;  %p1427_p11 = scmp.lt.s32.totalorder %s1947_s19, %s1425_s10 }
 0x1e7   : > { %p1422_p5 = pnand %p1421_p10, %p979_p3  ;;  %p1428_p12 = scmp.lt.s32.totalorder %s1426_s4, %s1420_s8 }
 0x1e9   : > { %p1423_p6 = pneg %p1422_p5  ;;  %p1429_p2 = por %p1428_p12, %p1427_p11 }
 0x1eb   : > { %p1430_p13 = pnand %p1429_p2, %p1423_p6 }
 0x1ed   : > { %1433 = shalt.err (!%p1430_p13)
}
 0x1ee   : > { %s1434_s22 = scalar_lea.hbm %s1945_s18, %s1935_s17  ;;  %s1438_s11 = scalar_lea.hbm %s2042_s6, 640 }
 0x1ef   : > { %p1435_p7 = scmp.ne.s32.totalorder %s1945_s18, %s1434_s22  ;;  %p1439_p1 = scmp.lt.u32.totalorder %s1945_s18, %s2042_s6 }
 0x1f0   : > { %p1440_p4 = scmp.lt.u32.totalorder %s1438_s11, %s1434_s22  ;;  %p1442_p5 = scmp.lt.u32.totalorder %s1434_s22, %s1945_s18 }
 0x1f1   : > { %p1436_p8 = pnand %p1435_p7, %p979_p3 }
 0x1f2   : > { %p1441_p10 = por %p1440_p4, %p1439_p1 }
 0x1f3   : > { %p1437_p9 = pneg %p1436_p8 }
 0x1f4   : > { %p1443_p6 = por %p1442_p5, %p1441_p10 }
 0x1f6   : > { %p1444_p11 = pnand %p1443_p6, %p1437_p9 }
 0x1f8   : > { %1447 = shalt.err (!%p1444_p11)
}
 0x1f9   : > { %s1544_s29 = smov 128   ;;  %s1545_s15 = smov 8  }
 0x1fa   : > { %775 = dma.vmem_to_hbm [thread:$0]  (%p979_p3), %s1947_s19, %s1935_s17, %s1945_s18, %s1887_s23, %s1544_s29, %s1544_s29, %s1545_s15  }
 0x1fb PF: > { %p2067_p12 = scmp.ne.s32.totalorder %s2053_s13, 0 }
 0x1fc   : > { %s779_s8 = smul.u32 (%p2067_p12), 3, %s1610_s28 }
 0x1fd   : > { %778 = sbr.rel (!%p2067_p12) target bundleno = 544 (0x220), region = 64 }
 0x1fe   : > { %s780_s12 = ssub.s32 (%p2067_p12), 5, %s779_s8 }
 0x1ff   : > { %p781_p2 = scmp.lt.s32.totalorder (%p2067_p12), %s780_s12, 3 }
 0x204   : > { %s2084_s12 = smov (!%p781_p2, %s780_s12), 3 }
 0x205   : > { %s1977_s10 = sshll.u32 %s2084_s12, 7 }
 0x206   : > { %s785_s4 = ssub.s32 384, %s1977_s10 }
 0x207   : > { %786 = vsyncadd %s1887_s23, %s785_s4  ;;  %p984_p3 = scmp.ne.s32.totalorder %s1977_s10, 0  ;;  %s994_s17 = smul.u32 384, %s1610_s28 }
 0x208   : > { %s791_s13 = sshll.u32 %s1833_s21, 4  ;;  %s1546_s20 = smov [#allocation11]   ;;  %s1989_s13 = int_to_ptr.vmem [resolvable:$true] %s791_s13 }
 0x209   : > { %s1987_s22 = scalar_lea.hbm %s2043_s7, %s994_s17  ;;  %s1448_s9 = scalar_lea.vmem %s1989_s13, %s1977_s10 }
 0x20a   : > { %p1449_p13 = scmp.ne.s32.totalorder %s1989_s13, %s1448_s9  ;;  %s1452_s11 = sshll.u32 %s1546_s20, 4  ;;  %s1453_s11 = int_to_ptr.vmem [resolvable:$false] %s1452_s11 }
 0x20b   : > { %s1454_s28 = scalar_lea.vmem %s1453_s11, 768  ;;  %p1455_p9 = scmp.lt.s32.totalorder %s1989_s13, %s1453_s11 }
 0x20c   : > { %p1450_p7 = pnand %p1449_p13, %p984_p3  ;;  %p1456_p1 = scmp.lt.s32.totalorder %s1454_s28, %s1448_s9 }
 0x20e   : > { %p1451_p8 = pneg %p1450_p7  ;;  %p1457_p4 = por %p1456_p1, %p1455_p9 }
 0x210   : > { %p1458_p10 = pnand %p1457_p4, %p1451_p8 }
 0x212   : > { %1461 = shalt.err (!%p1458_p10)
}
 0x213   : > { %s1462_s21 = scalar_lea.hbm %s1987_s22, %s1977_s10  ;;  %s1466_s29 = scalar_lea.hbm %s2043_s7, 640 }
 0x214   : > { %p1463_p5 = scmp.ne.s32.totalorder %s1987_s22, %s1462_s21  ;;  %p1467_p12 = scmp.lt.u32.totalorder %s1987_s22, %s2043_s7 }
 0x215   : > { %p1468_p2 = scmp.lt.u32.totalorder %s1466_s29, %s1462_s21  ;;  %p1470_p7 = scmp.lt.u32.totalorder %s1462_s21, %s1987_s22 }
 0x216   : > { %p1464_p6 = pnand %p1463_p5, %p984_p3 }
 0x217   : > { %p1469_p13 = por %p1468_p2, %p1467_p12 }
 0x218   : > { %p1465_p11 = pneg %p1464_p6 }
 0x219   : > { %p1471_p8 = por %p1470_p7, %p1469_p13 }
 0x21b   : > { %p1472_p9 = pnand %p1471_p8, %p1465_p11 }
 0x21d   : > { %1475 = shalt.err (!%p1472_p9)
}
 0x21e   : > { %s1547_s12 = smov 128   ;;  %s1548_s4 = smov 8  }
 0x21f   : > { %797 = dma.vmem_to_hbm [thread:$0]  (%p984_p3), %s1989_s13, %s1977_s10, %s1987_s22, %s1887_s23, %s1547_s12, %s1547_s12, %s1548_s4  }
 0x220 PF: > { %s806_s17 = sand.u32 1, %s1514_s24   ;;  %p2068_p1 = scmp.ne.s32.totalorder %s2054_s14, 0 }
 0x221   : > { %s807_s19 = scalar_lea.sflag [#allocation4], %s806_s17 }
 0x222   : > { %p1248_p4 = pnand %p960_p0, %p2068_p1 }
 0x224   : > { %1505 = dma.done.wait (!%p1248_p4), %s807_s19, 384  }
 0x225   : > { %1507 = vsyncadd (!%p1248_p4), %s807_s19, 4294966912  ;;  %s2069_s18 = sadd.s32 4294967294, %s1526_s27  }
 0x226   : > { %s815_s9 = sand.u32 1, %s2069_s18  }
 0x227   : > { %s816_s20 = scalar_lea.sflag [#allocation10], %s815_s9 }
 0x228   : > { %1509 = dma.done.wait (!%p1248_p4), %s816_s20, 768  }
 0x229   : > { %1511 = vsyncadd (!%p1248_p4), %s816_s20, 4294966528  ;;  %s2070_s23 = sld [smem:[#allocation17_spill]]  ;;  %p27_p3 = scmp.ge.s32.totalorder %s1614_s30, 4  }
 0x22a   : > { %s2071_s24 = smov %s1518_s25  ;;  %s2072_s25 = smov %s1522_s26 }
 0x22b   : > { %s2074_s27 = smov %s1614_s30  ;;  %29 = sbr.rel (!%p27_p3) target bundleno = 12 (0xc), region = 134 }
 0x22f   : > { %s2073_s26 = smov %s2070_s23 }
 0x232   :  { %830 = vsyncpa [#allocation3], 1 }
 0x233   :  { %832 = vsyncpa [#allocation3 + $0x1], 1 }
 0x234   :  { %833 = vsyncpa [#allocation6], 1 }
 0x235   :  { %835 = vsyncpa [#allocation6 + $0x1], 1 }
 0x236   :  { %836 = vsyncpa [#allocation4], 1 }
 0x237   :  { %838 = vsyncpa [#allocation4 + $0x1], 1 }
 0x238   :  { %839 = vsyncpa [#allocation10], 1 }
 0x239   :  { %841 = vsyncpa [#allocation10 + $0x1], 1 }

</bundles_post_ra>
